<compile_context>
chip_gen: v6e
topology: v6e:2x2x1
jax: 0.10.0
libtpu: 0.0.40
codegen_flags: <defaults>
</compile_context>

<pallas_src>
import jax
import jax.numpy as jnp
import numpy as np
from jax.experimental import pallas as pl
from jax.experimental.pallas import tpu as pltpu


def _round_up(a, b):
    return ((a + b - 1) // b) * b


def poly_kernel(x_ref, c_ref, t2_ref, o_ref):
    x = x_ref[...]          # (n, TB)  f32, batch on lanes
    c = c_ref[...]          # (n, 1)   f32, folded T0 + T1
    t2 = t2_ref[...]        # (n, n)   f32

    # Quadratic term via MXU: y[i, b] = sum_j T2[i, j] * x[j, b].
    y = jnp.dot(t2, x, preferred_element_type=jnp.float32)       # (n, TB)
    # out[b] = sum_i x[i, b] * (y[i, b] + c[i])  -> one sublane reduction,
    # written as a lane-dense (1, TB) slab (unmasked vst).
    o_ref[...] = jnp.sum(x * (y + c), axis=0, keepdims=True)


def polynomial_forward(x, t0, t1, t2, *, tb=None):
    """x: (B, n); t0: (1,); t1: (n,); t2: (n, n).  Returns (B,) energies."""
    B, n = x.shape
    # Fold degree-0 (size-1 broadcast) and degree-1 terms: sum_i (t0 + t1[i]) x_i.
    c = (t1.astype(jnp.float32) + t0.astype(jnp.float32)[0]).reshape(n, 1)
    t2f = t2.astype(jnp.float32)

    # Lane-major batch layout: (n, B).  (Wrapper-side transpose is layout
    # plumbing; the kernel itself is HBM-bandwidth bound either way.)
    xt = x.astype(jnp.float32).T

    if tb is None:
        # Large lane tiles amortize the ~0.35us/step overhead; each x block is
        # only n(=10)->16 padded sublanes x TB lanes, so double-buffered blocks
        # fit every generation's scoped-VMEM default (v5e 16MiB, v6e/v7x 32MiB).
        tb = min(_round_up(B, 128), 4096)
    Bp = _round_up(B, tb)
    if Bp != B:
        xt = jnp.pad(xt, ((0, 0), (0, Bp - B)))

    out = pl.pallas_call(
        poly_kernel,
        out_shape=jax.ShapeDtypeStruct((1, Bp), jnp.float32),
        grid=(Bp // tb,),
        in_specs=[
            pl.BlockSpec((n, tb), lambda i: (0, i)),   # streamed batch tile
            pl.BlockSpec((n, 1), lambda i: (0, 0)),    # c, VMEM resident
            pl.BlockSpec((n, n), lambda i: (0, 0)),    # T2, VMEM resident
        ],
        out_specs=pl.BlockSpec((1, tb), lambda i: (0, i)),
        compiler_params=pltpu.CompilerParams(
            dimension_semantics=("parallel",)),        # megacore shard on v7x
    )(xt, c, t2f)
    return out[0, :B]


def polynomial_reference(x, t0, t1, t2):
    s0 = t0[0] * jnp.sum(x, axis=-1)
    s1 = x @ t1
    s2 = jnp.einsum("ij,bi,bj->b", t2, x, x)
    return s0 + s1 + s2


if __name__ == "__main__":
    n = 10          # module default: n=10 variables
    degree = 2      # module default: degree=2

    key = jax.random.PRNGKey(0)
    k_x, k0, k1, k2, k_x2 = jax.random.split(key, 5)

    # "torch.rand"-style parameter init (uniform [0, 1)).
    t0 = jax.random.uniform(k0, (1,), dtype=jnp.float32)
    t1 = jax.random.uniform(k1, (n,), dtype=jnp.float32)
    t2 = jax.random.uniform(k2, (n, n), dtype=jnp.float32)

    # Small batch: single-tile path (B padded to 128 lanes).
    B = 8
    x = jax.random.normal(k_x, (B, n), dtype=jnp.float32)
    out = jax.block_until_ready(polynomial_forward(x, t0, t1, t2))
    ref = polynomial_reference(x, t0, t1, t2)
    np.testing.assert_allclose(np.asarray(out), np.asarray(ref),
                               rtol=1e-5, atol=1e-4)

    # Multi-tile path: grid of 3 parallel batch tiles with TB=128.
    B2 = 384
    x2 = jax.random.normal(k_x2, (B2, n), dtype=jnp.float32)
    out2 = jax.block_until_ready(polynomial_forward(x2, t0, t1, t2, tb=128))
    ref2 = polynomial_reference(x2, t0, t1, t2)
    np.testing.assert_allclose(np.asarray(out2), np.asarray(ref2),
                               rtol=1e-5, atol=1e-4)

    print("KERNEL_OK")
</pallas_src>

<mosaic_0001>
module attributes {stable_mosaic.version = 11 : i64} {
  func.func @poly_kernel(%arg0: i32, %arg1: memref<10x128xf32, #tpu.memory_space<vmem>>, %arg2: memref<10x1xf32, #tpu.memory_space<vmem>>, %arg3: memref<10x10xf32, #tpu.memory_space<vmem>>, %arg4: memref<1x128xf32, #tpu.memory_space<vmem>>) attributes {dimension_semantics = [#tpu.dimension_semantics<parallel>], iteration_bounds = array<i64: 1>, scalar_prefetch = 0 : i64, scratch_operands = 0 : i64, tpu.core_type = #tpu.core_type<tc>, window_params = [{transform_indices = @transform_0, window_bounds = array<i64: 10, 128>}, {pipeline_mode = #tpu.pipeline_mode<synchronous>, transform_indices = @transform_1, window_bounds = array<i64: 10, 1>}, {pipeline_mode = #tpu.pipeline_mode<synchronous>, transform_indices = @transform_2, window_bounds = array<i64: 10, 10>}, {transform_indices = @transform_3, window_bounds = array<i64: 1, 128>}]} {
    %c0 = arith.constant 0 : index
    %c0_0 = arith.constant 0 : index
    %0 = vector.load %arg1[%c0, %c0_0] : memref<10x128xf32, #tpu.memory_space<vmem>>, vector<10x128xf32>
    %c0_1 = arith.constant 0 : index
    %c0_2 = arith.constant 0 : index
    %1 = vector.load %arg2[%c0_1, %c0_2] : memref<10x1xf32, #tpu.memory_space<vmem>>, vector<10x1xf32>
    %c0_3 = arith.constant 0 : index
    %c0_4 = arith.constant 0 : index
    %2 = vector.load %arg3[%c0_3, %c0_4] : memref<10x10xf32, #tpu.memory_space<vmem>>, vector<10x10xf32>
    %cst = arith.constant dense<0.000000e+00> : vector<10x128xf32>
    %3 = tpu.matmul %2, %0, %cst {dimension_numbers = #tpu.dot_dimension_numbers<[1], [0], [0], [1], [0, 0, 1, 1], [], []>} : vector<10x10xf32>, vector<10x128xf32>, vector<10x128xf32> -> vector<10x128xf32>
    %4 = vector.broadcast %1 : vector<10x1xf32> to vector<10x128xf32>
    %5 = arith.addf %3, %4 : vector<10x128xf32>
    %6 = arith.mulf %0, %5 : vector<10x128xf32>
    %cst_5 = arith.constant dense<0.000000e+00> : vector<128xf32>
    %7 = vector.multi_reduction <add>, %6, %cst_5 [0] : vector<10x128xf32> to vector<128xf32>
    %8 = vector.shape_cast %7 : vector<128xf32> to vector<1x128xf32>
    %c0_6 = arith.constant 0 : index
    %c0_7 = arith.constant 0 : index
    %9 = vector.load %arg4[%c0_6, %c0_7] : memref<1x128xf32, #tpu.memory_space<vmem>>, vector<1x128xf32>
    tpu.vector_store %arg4[%c0_6, %c0_7], %8 {strides = array<i32>} : memref<1x128xf32, #tpu.memory_space<vmem>>, vector<1x128xf32>,
    return
  }
  func.func @transform_0(%arg0: i32) -> (i32, i32) {
    %c0_i32 = arith.constant 0 : i32
    %c0_i32_0 = arith.constant 0 : i32
    return %c0_i32, %arg0 : i32, i32
  }
  func.func @transform_1(%arg0: i32) -> (i32, i32) {
    %c0_i32 = arith.constant 0 : i32
    %c0_i32_0 = arith.constant 0 : i32
    %c0_i32_1 = arith.constant 0 : i32
    return %c0_i32, %c0_i32_0 : i32, i32
  }
  func.func @transform_2(%arg0: i32) -> (i32, i32) {
    %c0_i32 = arith.constant 0 : i32
    %c0_i32_0 = arith.constant 0 : i32
    %c0_i32_1 = arith.constant 0 : i32
    return %c0_i32, %c0_i32_0 : i32, i32
  }
  func.func @transform_3(%arg0: i32) -> (i32, i32) {
    %c0_i32 = arith.constant 0 : i32
    %c0_i32_0 = arith.constant 0 : i32
    return %c0_i32, %arg0 : i32, i32
  }
}

</mosaic_0001>

<bundles_post_ra>
// kernel: tpu_custom_call.1
= control target key start
LH: loop header
LB: loop body
LE: loop exit
PB: predicated region body
PF: predicated region fallthrough
CT: control target
= control target key end

     0   :  { %8 = vsyncpa [#allocation3], 0  ;;  %s267_s0 = inlined_call_operand.vmem [shape: f32[10,128], index: 0, kind: input, shape index: {}]   ;;  %s268_s1 = inlined_call_operand.vmem [shape: f32[10,1], index: 1, kind: input, shape index: {}]   ;;  %s269_s2 = inlined_call_operand.hbm [shape: f32[10,10], index: 2, kind: input, shape index: {}]   ;;  %s270_s3 = inlined_call_operand.hbm [shape: f32[1,128], index: 3, kind: output, shape index: {}]  }
   0x1   :  { %9 = vsyncpa [#allocation4], 0  ;;  %s221_s12 = smov [#allocation2]  }
   0x2   :  { %s19_s13 = sshll.u32 %s221_s12, 4  ;;  %s20_s13 = int_to_ptr.vmem [resolvable:$true] %s19_s13 }
   0x3   :  { %s185_s14 = scalar_lea.vmem %s20_s13, 256  ;;  %p190_p1 = scmp.lt.s32.totalorder %s20_s13, %s20_s13 }
   0x4   :  { %p186_p0 = scmp.ne.s32.totalorder %s20_s13, %s185_s14  ;;  %p191_p2 = scmp.lt.s32.totalorder %s185_s14, %s185_s14 }
   0x6   :  { %p192_p3 = por %p191_p2, %p190_p1 }
   0x8   :  { %p193_p4 = pnand %p192_p3, %p186_p0 }
   0xa   :  { %196 = shalt.err (!%p193_p4)
}
   0xb   :  { %s222_s15 = smov 128   ;;  %s223_s16 = smov 8  }
   0xc   :  { %25 = dma.hbm_to_vmem [thread:$0]  %s269_s2, 256, %s20_s13, [#allocation3], %s222_s15, %s222_s15, %s223_s16  }
   0xd   :  { %217 = dma.done.wait [#allocation3], 256  }
   0xe   :  { %218 = vsyncadd [#allocation3], 4294967040  ;;  %v224_v0 = vmov 0   ;;  %vm52_vm0 = vcmask 1041408   ;;  %vm45_vm1 = vcmask 80896   ;;  %v29_v2 = vld [vmem:[%s267_s0] sm:$0xff] }
   0xf   :  { %176 = vset.pattern.permute.xlu0 %v224_v0  ;;  %v30_v1 = vld [vmem:[%s267_s0 + $0x8] sm:$0x3]  ;;  %v33_v3 = vld [vmem:[#allocation2] sm:$0xff]  ;;  %s225_s0 = smov [#allocation5]  }
  0x10   :  { %164 = vmatprep.subr.msk.mxu0 %vm52_vm0, %v30_v1  ;;  %168 = vmatprep.mubr.msk.f32.mxu0 %vm45_vm1, %v33_v3  ;;  %v32_v4 = vld [vmem:[%s268_s1 + $0x8] sm:$0x3]  ;;  %v31_v6 = vld [vmem:[%s268_s1] sm:$0xff]  ;;  %s148_s1 = sshll.u32 %s225_s0, 4  ;;  %s149_s1 = int_to_ptr.vmem [resolvable:$true] %s148_s1 }
  0x11   :  { %165 = vmatpush3.msk.msra.mxu0 %vm52_vm0, %v30_v1  ;;  %v34_v5 = vld [vmem:[#allocation2 + $0x8] sm:$0x3]  ;;  %42 = vperm.xlu0 %176, %v32_v4   ;;  %s197_s26 = scalar_lea.vmem %s149_s1, 16  ;;  %s201_s27 = scalar_lea.vmem %s149_s1, 32 }
  0x12   :  { %166 = vmatprep.subr.mxu0 %v29_v2  ;;  %p198_p5 = scmp.ne.s32.totalorder %s149_s1, %s197_s26  ;;  %p202_p6 = scmp.lt.s32.totalorder %s149_s1, %s149_s1 }
  0x13   :  { %167 = vmatpush3.msra.mxu0 %v29_v2  ;;  %p203_p7 = scmp.lt.s32.totalorder %s201_s27, %s197_s26 }
  0x14   :  { %169 = vmatmul.mubr.msk.f32.vlgmr.msra.gmra.mxu0 %vm45_vm1, %v34_v5 }
  0x15   :  { %37 = vperm.xlu0 %176, %v31_v6   ;;  %p204_p8 = por %p203_p7, %p202_p6 }
  0x17   :  { %p205_p9 = pnand %p204_p8, %p198_p5 }
  0x8c   :  { %v43_v7 = vpop.permute.xlu0 %42 }
  0x90   :  { %v38_v10 = vpop.permute.xlu0 %37 }
  0xd4   :  { %v170_v8 = vpop.f32.mrf.mxu0 }
  0xd5   :  { %v128_v9 = vadd.f32 %v170_v8, %v43_v7 }
  0xd6   :  { %v122_v11 = vpop.f32.mrf.mxu0 }
  0xd7   :  { %v132_v12 = vmul.f32 %v128_v9, %v30_v1  ;;  %v123_v13 = vadd.f32 %v122_v11, %v38_v10 }
  0xd9   :  { %v133_v14 = vsel %vm52_vm0, %v132_v12, 0.0  ;;  %v131_v15 = vmul.f32 %v123_v13, %v29_v2 }
  0xdb   :  { %v134_v16 = vadd.f32 %v133_v14, %v131_v15 }
  0xdd   :  { %v135_v17 = vrot.slane %v134_v16, 4 }
  0xdf   :  { %v136_v18 = vadd.f32 %v135_v17, %v134_v16 }
  0xe1   :  { %v137_v19 = vrot.slane %v136_v18, 2 }
  0xe3   :  { %v138_v20 = vadd.f32 %v137_v19, %v136_v18 }
  0xe5   :  { %v139_v21 = vrot.slane %v138_v20, 1 }
  0xe7   :  { %v140_v22 = vadd.f32 %v139_v21, %v138_v20 }
  0xe9   :  { %141 = vst [vmem:[#allocation5] sm:$0x1] %v140_v22 }
  0xea   :  { %208 = shalt.err (!%p205_p9)
}
  0xeb   :  { %151 = dma.vmem_to_hbm [thread:$0]  %s149_s1, 16, %s270_s3, [#allocation4]  }
  0xec   :  { %219 = dma.done.wait [#allocation4], 16  }
  0xed   :  { %220 = vsyncadd [#allocation4], 4294967280 }
  0xee   :  { %155 = vsyncpa [#allocation3], 1 }
  0xef   :  { %156 = vsyncpa [#allocation4], 1 }

</bundles_post_ra>
